<compile_context>
chip_gen: v6e
topology: v6e:2x2x1
jax: 0.10.0
libtpu: 0.0.40
codegen_flags: <defaults>
</compile_context>

<pallas_src>
import jax
import jax.numpy as jnp
from jax.experimental import pallas as pl
from jax.experimental.pallas import tpu as pltpu

# ----------------------------------------------------------------------------
# Synthetic config (stand-in for `config.phi_net` in the original script).
# ----------------------------------------------------------------------------
DIM_OF_INPUT = 6
DIM_LAYER0 = 32
DIM_LAYER1 = 32
DIM_LAYER2 = 32
DIM_OF_OUTPUT = 4            # fc4 emits DIM_OF_OUTPUT - 1; ones column folded into fc4.


def _round_up(n, m):
    return (n + m - 1) // m * m


# Packed parameter slab (transposed orientation): weights stored (out, in) so the
# in-kernel matmul is W @ h^T; biases stored as columns, one lane per layer.
_W1_OFF = 0                                    # rows  0.. 31, lanes 0..5   (32, 6)
_W2_OFF = _W1_OFF + _round_up(DIM_LAYER0, 8)   # rows 32.. 63, lanes 0..31  (32, 32)
_W3_OFF = _W2_OFF + _round_up(DIM_LAYER1, 8)   # rows 64.. 95, lanes 0..31  (32, 32)
_W4_OFF = _W3_OFF + _round_up(DIM_LAYER2, 8)   # rows 96.. 99, lanes 0..31  (4, 32), row 3 zero
_B_OFF = _W4_OFF + 8                           # rows 104..135: lane l holds layer-l bias column
_SLAB_ROWS = _B_OFF + _round_up(max(DIM_LAYER0, DIM_LAYER1, DIM_LAYER2), 8)   # 136
_SLAB_LANES = 128


def phinet_kernel(xT_ref, slab_ref, oT_ref):
    """Whole forward pass for one batch tile, batch on the lane axis.

    xT_ref:   (DIM_OF_INPUT, tile_b)   compute dtype (x transposed)
    slab_ref: (_SLAB_ROWS, 128)        compute dtype, resident packed params
    oT_ref:   (DIM_OF_OUTPUT, tile_b)  y transposed; last row == 1.0
    """
    f32 = jnp.float32
    xT = xT_ref[...]
    cd = xT.dtype

    # Static, 8-row-aligned slices out of the resident parameter slab.
    w1 = slab_ref[_W1_OFF:_W1_OFF + DIM_LAYER0, :DIM_OF_INPUT]
    w2 = slab_ref[_W2_OFF:_W2_OFF + DIM_LAYER1, :DIM_LAYER0]
    w3 = slab_ref[_W3_OFF:_W3_OFF + DIM_LAYER2, :DIM_LAYER1]
    w4 = slab_ref[_W4_OFF:_W4_OFF + DIM_OF_OUTPUT, :DIM_LAYER2]
    b1 = slab_ref[_B_OFF:_B_OFF + DIM_LAYER0, 0:1].astype(f32)
    b2 = slab_ref[_B_OFF:_B_OFF + DIM_LAYER1, 1:2].astype(f32)
    b3 = slab_ref[_B_OFF:_B_OFF + DIM_LAYER2, 2:3].astype(f32)
    b4 = slab_ref[_B_OFF:_B_OFF + DIM_OF_OUTPUT, 3:4].astype(f32)   # last entry = 1.0

    # MXU matmuls with f32 accumulation; bias/ReLU math stays f32.
    h = jnp.maximum(jnp.dot(w1, xT, preferred_element_type=f32) + b1, 0.0)
    h = jnp.maximum(jnp.dot(w2, h.astype(cd), preferred_element_type=f32) + b2, 0.0)
    h = jnp.maximum(jnp.dot(w3, h.astype(cd), preferred_element_type=f32) + b3, 0.0)
    y = jnp.dot(w4, h.astype(cd), preferred_element_type=f32) + b4

    oT_ref[...] = y.astype(oT_ref.dtype)       # lane-dense store, batch on lanes


def pack_params(params, dtype=jnp.bfloat16):
    """Pack nn.Linear-convention W (out, in) / b (out,) into one slab in the
    compute dtype; fold the ones column into fc4 (zero weight row + bias 1.0)."""
    (w1, b1), (w2, b2), (w3, b3), (w4, b4) = params
    w4f = jnp.concatenate([w4, jnp.zeros((1, w4.shape[1]), w4.dtype)], axis=0)   # (4, 32)
    b4f = jnp.concatenate([b4.reshape(-1), jnp.ones((1,), b4.dtype)])            # (4,)

    slab = jnp.zeros((_SLAB_ROWS, _SLAB_LANES), jnp.float32)
    slab = slab.at[_W1_OFF:_W1_OFF + w1.shape[0], :w1.shape[1]].set(w1)
    slab = slab.at[_W2_OFF:_W2_OFF + w2.shape[0], :w2.shape[1]].set(w2)
    slab = slab.at[_W3_OFF:_W3_OFF + w3.shape[0], :w3.shape[1]].set(w3)
    slab = slab.at[_W4_OFF:_W4_OFF + w4f.shape[0], :w4f.shape[1]].set(w4f)
    slab = slab.at[_B_OFF:_B_OFF + b1.size, 0].set(b1.reshape(-1))
    slab = slab.at[_B_OFF:_B_OFF + b2.size, 1].set(b2.reshape(-1))
    slab = slab.at[_B_OFF:_B_OFF + b3.size, 2].set(b3.reshape(-1))
    slab = slab.at[_B_OFF:_B_OFF + b4f.size, 3].set(b4f)
    return slab.astype(dtype)


def phinet_forward(x, slab, *, tile_b=2048, out_dtype=jnp.float32):
    """x: [B, DIM_OF_INPUT] (or 1-D [DIM_OF_INPUT]).  Returns [B, DIM_OF_OUTPUT].

    Compute dtype == slab.dtype (bf16 by default); accumulation is always f32.
    """
    if x.ndim == 1:   # parity with the PyTorch 1-D branch
        return phinet_forward(x[None, :], slab, tile_b=tile_b, out_dtype=out_dtype)[0]

    B, din = x.shape
    assert din == DIM_OF_INPUT, din
    cd = slab.dtype

    # Single fused pass over x: cast + transpose (batch -> 128-lane axis).
    # No feature-pad / batch-pad copies; ragged tails use clipped boundary blocks.
    xT = x.T.astype(cd)                                    # (DIN, B)

    # Batch tile: big tiles amortize the ~0.35us/step overhead; keep >=2 grid
    # steps for mid-size batches so both v7x TensorCores get work.
    if B <= tile_b:
        tile_eff = _round_up(pl.cdiv(B, 2), 128) if B > 256 else B
    else:
        tile_eff = tile_b
    grid = (pl.cdiv(B, tile_eff),)

    outT = pl.pallas_call(
        phinet_kernel,
        out_shape=jax.ShapeDtypeStruct((DIM_OF_OUTPUT, B), out_dtype),
        grid_spec=pltpu.PrefetchScalarGridSpec(
            num_scalar_prefetch=0,
            grid=grid,
            in_specs=[
                pl.BlockSpec((DIM_OF_INPUT, tile_eff), lambda i: (0, i)),      # x^T batch tile
                pl.BlockSpec((_SLAB_ROWS, _SLAB_LANES), lambda i: (0, 0)),     # resident params
            ],
            out_specs=pl.BlockSpec((DIM_OF_OUTPUT, tile_eff), lambda i: (0, i)),
        ),
        compiler_params=pltpu.CompilerParams(
            dimension_semantics=("parallel",)),
    )(xT, slab)
    return outT.T                                          # (B, DIM_OF_OUTPUT)


def init_params(key):
    """nn.Linear-style init/shapes: W (out, in), b (out,)."""
    dims = [DIM_OF_INPUT, DIM_LAYER0, DIM_LAYER1, DIM_LAYER2, DIM_OF_OUTPUT - 1]
    params = []
    for idx, (fan_in, fan_out) in enumerate(zip(dims[:-1], dims[1:])):
        kw, kb = jax.random.split(jax.random.fold_in(key, idx))
        bound = 1.0 / (fan_in ** 0.5)
        w = jax.random.uniform(kw, (fan_out, fan_in), jnp.float32, -bound, bound)
        b = jax.random.uniform(kb, (fan_out,), jnp.float32, -bound, bound)
        params.append((w, b))
    return params


def phinet_reference(x, params):
    """Pure-JAX reference matching the PyTorch forward."""
    (w1, b1), (w2, b2), (w3, b3), (w4, b4) = params
    h = jnp.maximum(x @ w1.T + b1, 0.0)
    h = jnp.maximum(h @ w2.T + b2, 0.0)
    h = jnp.maximum(h @ w3.T + b3, 0.0)
    y = h @ w4.T + b4
    return jnp.concatenate([y, jnp.ones((x.shape[0], 1), y.dtype)], axis=-1)


if __name__ == "__main__":
    key = jax.random.PRNGKey(0)
    kx, kp = jax.random.split(key)
    params = init_params(kp)

    # --- f32 path, small batch: single un-gridded lane-dense block ---
    slab_f32 = pack_params(params, dtype=jnp.float32)
    B = 16
    x = jax.random.normal(kx, (B, DIM_OF_INPUT), dtype=jnp.float32)
    out = jax.block_until_ready(phinet_forward(x, slab_f32))
    ref = phinet_reference(x, params)
    assert out.shape == (B, DIM_OF_OUTPUT), out.shape
    assert jnp.all(out[:, -1] == 1.0), "ones column mismatch"
    assert jnp.allclose(out, ref, atol=1e-4, rtol=1e-4), "mismatch vs reference (f32)"

    # --- default bf16 path, ragged batch -> 2 grid steps, clipped last block ---
    slab_bf16 = pack_params(params)                        # bf16 by default
    B2 = 1000
    x2 = jax.random.normal(jax.random.fold_in(kx, 1), (B2, DIM_OF_INPUT), jnp.float32)
    out2 = jax.block_until_ready(phinet_forward(x2, slab_bf16))
    ref2 = phinet_reference(x2, params)
    assert out2.shape == (B2, DIM_OF_OUTPUT)
    assert jnp.all(out2[:, -1] == 1.0), "ones column mismatch (bf16)"
    assert jnp.allclose(out2, ref2, atol=5e-2, rtol=5e-2), "mismatch vs reference (bf16)"

    # --- 1-D input branch parity with the PyTorch module ---
    out1d = jax.block_until_ready(phinet_forward(x[0], slab_f32))
    assert out1d.shape == (DIM_OF_OUTPUT,)
    assert jnp.allclose(out1d, ref[0], atol=1e-4, rtol=1e-4), "mismatch vs reference (1-D)"

    print("KERNEL_OK")
</pallas_src>

<mosaic_0001>
module attributes {stable_mosaic.version = 11 : i64} {
  func.func @phinet_kernel(%arg0: i32, %arg1: memref<6x16xf32, #tpu.memory_space<vmem>>, %arg2: memref<136x128xf32, #tpu.memory_space<vmem>>, %arg3: memref<4x16xf32, #tpu.memory_space<vmem>>) attributes {dimension_semantics = [#tpu.dimension_semantics<parallel>], iteration_bounds = array<i64: 1>, scalar_prefetch = 0 : i64, scratch_operands = 0 : i64, tpu.core_type = #tpu.core_type<tc>, window_params = [{transform_indices = @transform_0, window_bounds = array<i64: 6, 16>}, {pipeline_mode = #tpu.pipeline_mode<synchronous>, transform_indices = @transform_1, window_bounds = array<i64: 136, 128>}, {transform_indices = @transform_2, window_bounds = array<i64: 4, 16>}]} {
    %c0 = arith.constant 0 : index
    %c0_0 = arith.constant 0 : index
    %0 = vector.load %arg1[%c0, %c0_0] : memref<6x16xf32, #tpu.memory_space<vmem>>, vector<6x16xf32>
    %c0_1 = arith.constant 0 : index
    %c0_2 = arith.constant 0 : index
    %1 = vector.load %arg2[%c0_1, %c0_2] : memref<136x128xf32, #tpu.memory_space<vmem>>, vector<32x6xf32>
    %c32 = arith.constant 32 : index
    %c0_3 = arith.constant 0 : index
    %2 = vector.load %arg2[%c32, %c0_3] : memref<136x128xf32, #tpu.memory_space<vmem>>, vector<32x32xf32>
    %c64 = arith.constant 64 : index
    %c0_4 = arith.constant 0 : index
    %3 = vector.load %arg2[%c64, %c0_4] : memref<136x128xf32, #tpu.memory_space<vmem>>, vector<32x32xf32>
    %c96 = arith.constant 96 : index
    %c0_5 = arith.constant 0 : index
    %4 = vector.load %arg2[%c96, %c0_5] : memref<136x128xf32, #tpu.memory_space<vmem>>, vector<4x32xf32>
    %c104 = arith.constant 104 : index
    %c0_6 = arith.constant 0 : index
    %5 = vector.load %arg2[%c104, %c0_6] : memref<136x128xf32, #tpu.memory_space<vmem>>, vector<32x1xf32>
    %c104_7 = arith.constant 104 : index
    %c1 = arith.constant 1 : index
    %6 = vector.load %arg2[%c104_7, %c1] : memref<136x128xf32, #tpu.memory_space<vmem>>, vector<32x1xf32>
    %c104_8 = arith.constant 104 : index
    %c2 = arith.constant 2 : index
    %7 = vector.load %arg2[%c104_8, %c2] : memref<136x128xf32, #tpu.memory_space<vmem>>, vector<32x1xf32>
    %c104_9 = arith.constant 104 : index
    %c3 = arith.constant 3 : index
    %8 = vector.load %arg2[%c104_9, %c3] : memref<136x128xf32, #tpu.memory_space<vmem>>, vector<4x1xf32>
    %cst = arith.constant dense<0.000000e+00> : vector<32x16xf32>
    %9 = tpu.matmul %1, %0, %cst {dimension_numbers = #tpu.dot_dimension_numbers<[1], [0], [0], [1], [0, 0, 1, 1], [], []>} : vector<32x6xf32>, vector<6x16xf32>, vector<32x16xf32> -> vector<32x16xf32>
    %10 = vector.broadcast %5 : vector<32x1xf32> to vector<32x16xf32>
    %11 = arith.addf %9, %10 : vector<32x16xf32>
    %cst_10 = arith.constant 0.000000e+00 : f32
    %12 = vector.broadcast %cst_10 : f32 to vector<32x16xf32>
    %13 = arith.maximumf %11, %12 : vector<32x16xf32>
    %cst_11 = arith.constant dense<0.000000e+00> : vector<32x16xf32>
    %14 = tpu.matmul %2, %13, %cst_11 {dimension_numbers = #tpu.dot_dimension_numbers<[1], [0], [0], [1], [0, 0, 1, 1], [], []>} : vector<32x32xf32>, vector<32x16xf32>, vector<32x16xf32> -> vector<32x16xf32>
    %15 = vector.broadcast %6 : vector<32x1xf32> to vector<32x16xf32>
    %16 = arith.addf %14, %15 : vector<32x16xf32>
    %cst_12 = arith.constant 0.000000e+00 : f32
    %17 = vector.broadcast %cst_12 : f32 to vector<32x16xf32>
    %18 = arith.maximumf %16, %17 : vector<32x16xf32>
    %cst_13 = arith.constant dense<0.000000e+00> : vector<32x16xf32>
    %19 = tpu.matmul %3, %18, %cst_13 {dimension_numbers = #tpu.dot_dimension_numbers<[1], [0], [0], [1], [0, 0, 1, 1], [], []>} : vector<32x32xf32>, vector<32x16xf32>, vector<32x16xf32> -> vector<32x16xf32>
    %20 = vector.broadcast %7 : vector<32x1xf32> to vector<32x16xf32>
    %21 = arith.addf %19, %20 : vector<32x16xf32>
    %cst_14 = arith.constant 0.000000e+00 : f32
    %22 = vector.broadcast %cst_14 : f32 to vector<32x16xf32>
    %23 = arith.maximumf %21, %22 : vector<32x16xf32>
    %cst_15 = arith.constant dense<0.000000e+00> : vector<4x16xf32>
    %24 = tpu.matmul %4, %23, %cst_15 {dimension_numbers = #tpu.dot_dimension_numbers<[1], [0], [0], [1], [0, 0, 1, 1], [], []>} : vector<4x32xf32>, vector<32x16xf32>, vector<4x16xf32> -> vector<4x16xf32>
    %25 = vector.broadcast %8 : vector<4x1xf32> to vector<4x16xf32>
    %26 = arith.addf %24, %25 : vector<4x16xf32>
    %c0_16 = arith.constant 0 : index
    %c0_17 = arith.constant 0 : index
    %27 = vector.load %arg3[%c0_16, %c0_17] : memref<4x16xf32, #tpu.memory_space<vmem>>, vector<4x16xf32>
    tpu.vector_store %arg3[%c0_16, %c0_17], %26 {strides = array<i32>} : memref<4x16xf32, #tpu.memory_space<vmem>>, vector<4x16xf32>,
    return
  }
  func.func @transform_0(%arg0: i32) -> (i32, i32) {
    %c0_i32 = arith.constant 0 : i32
    %c0_i32_0 = arith.constant 0 : i32
    return %c0_i32, %arg0 : i32, i32
  }
  func.func @transform_1(%arg0: i32) -> (i32, i32) {
    %c0_i32 = arith.constant 0 : i32
    %c0_i32_0 = arith.constant 0 : i32
    %c0_i32_1 = arith.constant 0 : i32
    return %c0_i32, %c0_i32_0 : i32, i32
  }
  func.func @transform_2(%arg0: i32) -> (i32, i32) {
    %c0_i32 = arith.constant 0 : i32
    %c0_i32_0 = arith.constant 0 : i32
    return %c0_i32, %arg0 : i32, i32
  }
}

</mosaic_0001>

<bundles_post_ra>
// kernel: tpu_custom_call.1
= control target key start
LH: loop header
LB: loop body
LE: loop exit
PB: predicated region body
PF: predicated region fallthrough
CT: control target
= control target key end

     0   :  { %7 = vsyncpa [#allocation3], 0  ;;  %s733_s0 = inlined_call_operand.hbm [shape: f32[6,16], index: 0, kind: input, shape index: {}]   ;;  %s734_s1 = inlined_call_operand.hbm [shape: f32[136,128], index: 1, kind: input, shape index: {}]   ;;  %s735_s2 = inlined_call_operand.hbm [shape: f32[4,16], index: 2, kind: output, shape index: {}]  }
   0x1   :  { %8 = vsyncpa [#allocation6], 0 }
   0x2   :  { %9 = vsyncpa [#allocation4], 0  ;;  %s685_s9 = smov [#allocation2]   ;;  %s686_s11 = smov [#allocation5]  }
   0x3   :  { %s16_s10 = sshll.u32 %s685_s9, 4  ;;  %s25_s12 = sshll.u32 %s686_s11, 4  ;;  %s17_s10 = int_to_ptr.vmem [resolvable:$true] %s16_s10  ;;  %s26_s12 = int_to_ptr.vmem [resolvable:$true] %s25_s12 }
   0x4   :  { %s627_s13 = scalar_lea.vmem %s17_s10, 128  ;;  %p632_p1 = scmp.lt.s32.totalorder %s17_s10, %s17_s10 }
   0x5   :  { %p628_p0 = scmp.ne.s32.totalorder %s17_s10, %s627_s13  ;;  %p633_p2 = scmp.lt.s32.totalorder %s627_s13, %s627_s13 }
   0x7   :  { %p634_p3 = por %p633_p2, %p632_p1 }
   0x9   :  { %p635_p4 = pnand %p634_p3, %p628_p0 }
   0xb   :  { %638 = shalt.err (!%p635_p4)
}
   0xc   :  { %19 = dma.hbm_to_vmem [thread:$0]  %s733_s0, 128, %s17_s10, [#allocation3]  }
   0xd   :  { %s647_s16 = scalar_lea.vmem %s26_s12, 2176  ;;  %p652_p6 = scmp.lt.s32.totalorder %s26_s12, %s26_s12 }
   0xe   :  { %p648_p5 = scmp.ne.s32.totalorder %s26_s12, %s647_s16  ;;  %p653_p7 = scmp.lt.s32.totalorder %s647_s16, %s647_s16 }
  0x10   :  { %p654_p8 = por %p653_p7, %p652_p6 }
  0x12   :  { %p655_p9 = pnand %p654_p8, %p648_p5 }
  0x14   :  { %658 = shalt.err (!%p655_p9)
}
  0x15   :  { %s687_s17 = smov 128   ;;  %s688_s18 = smov 8  }
  0x16   :  { %31 = dma.hbm_to_vmem [thread:$0]  %s734_s1, 2176, %s26_s12, [#allocation6], %s687_s17, %s687_s17, %s688_s18  }
  0x17   :  { %679 = dma.done.wait [#allocation3], 128  }
  0x18   :  { %680 = vsyncadd [#allocation3], 4294967168 }
  0x19   :  { %681 = dma.done.wait [#allocation6], 2176  }
  0x1a   :  { %682 = vsyncadd [#allocation6], 4294965120  ;;  %v689_v0 = vmov 0   ;;  %vm90_vm0 = vcmask 1045504   ;;  %vm77_vm1 = vcmask 48128   ;;  %v39_v2 = vld [vmem:[#allocation5] sm:$0xff] }
  0x1b   :  { %613 = vset.pattern.permute.xlu1 %v689_v0  ;;  %612 = vset.pattern.permute.xlu0 %v689_v0  ;;  %v38_v1 = vld [vmem:[#allocation2] sm:$0x3f]  ;;  %v40_v3 = vld [vmem:[#allocation5 + $0x8] sm:$0xff]  ;;  %v41_v4 = vld [vmem:[#allocation5 + $0x10] sm:$0xff]  ;;  %vm199_vm2 = vcmask 261120   ;;  %v690_v11 = vmov 1  }
  0x1c   :  { %554 = vmatprep.subr.msk.mxu0 %vm90_vm0, %v38_v1  ;;  %556 = vmatprep.mubr.msk.f32.mxu0 %vm77_vm1, %v39_v2  ;;  %v55_v5 = vld [vmem:[#allocation5 + $0x80] sm:$0xff]  ;;  %v53_v6 = vld [vmem:[#allocation5 + $0x70] sm:$0xff]  ;;  %v54_v7 = vld [vmem:[#allocation5 + $0x78] sm:$0xff]  ;;  %v691_v32 = vmov 2   ;;  %v692_v52 = vmov 0.0   ;;  %vm693_vm3 = vmmov 0  }
  0x1d   :  { %555 = vmatpush3.msk.msra.mxu0 %vm90_vm0, %v38_v1  ;;  %74 = vperm.xlu0 %612, %v55_v5   ;;  %v42_v8 = vld [vmem:[#allocation5 + $0x18] sm:$0xff]  ;;  %v52_v9 = vld [vmem:[#allocation5 + $0x68] sm:$0xff]  ;;  %v43_v10 = vld [vmem:[#allocation5 + $0x20] sm:$0xff]  ;;  %v694_v54 = vmov 3   ;;  %s695_s0 = smov [#allocation7]   ;;  %vm496_vm4 = vcmask 125952  }
  0x1e   :  { %557 = vmatmul.mubr.msk.f32.vlgmr.msra.gmra.mxu0 %vm77_vm1, %v40_v3  ;;  %64 = vperm.xlu1 %613, %v53_v6   ;;  %v44_v28 = vld [vmem:[#allocation5 + $0x28] sm:$0xff]  ;;  %v45_v29 = vld [vmem:[#allocation5 + $0x30] sm:$0xff]  ;;  %v46_v30 = vld [vmem:[#allocation5 + $0x38] sm:$0xff]  ;;  %s504_s1 = sshll.u32 %s695_s0, 4  ;;  %s505_s1 = int_to_ptr.vmem [resolvable:$true] %s504_s1 }
  0x1f   :  { %559 = vmatprep.mubr.msk.f32.mxu0 %vm77_vm1, %v41_v4  ;;  %570 = vmatprep.mubr.msk.f32.mxu1 %vm199_vm2, %v43_v10  ;;  %v47_v31 = vld [vmem:[#allocation5 + $0x40] sm:$0xff]  ;;  %v48_v49 = vld [vmem:[#allocation5 + $0x48] sm:$0xff]  ;;  %v49_v50 = vld [vmem:[#allocation5 + $0x50] sm:$0xff]  ;;  %s659_s21 = scalar_lea.vmem %s505_s1, 64  ;;  %p664_p11 = scmp.lt.s32.totalorder %s505_s1, %s505_s1 }
  0x20   :  { %v50_v51 = vld [vmem:[#allocation5 + $0x58] sm:$0xff]  ;;  %v56_v53 = vld [vmem:[#allocation5 + $0x68] sm:$0xf]  ;;  %p660_p10 = scmp.ne.s32.totalorder %s505_s1, %s659_s21  ;;  %p665_p12 = scmp.lt.s32.totalorder %s659_s21, %s659_s21 }
  0x21   :  { %69 = vperm.xlu0 %612, %v54_v7  }
  0x22   :  { %560 = vmatmul.mubr.msk.f32.gmra.mxu0 %vm77_vm1, %v42_v8  ;;  %59 = vperm.xlu1 %613, %v52_v9   ;;  %p666_p13 = por %p665_p12, %p664_p11 }
  0x23   :  { %584 = vmatprep.mubr.msk.f32.mxu0 %vm199_vm2, %v47_v31 }
  0x24   :  { %p667_p0 = pnand %p666_p13, %p660_p10 }
  0x25   :  { %614 = vset.pattern.permute.xlu0 %v690_v11 }
  0x26   :  { %615 = vset.pattern.permute.xlu1 %v690_v11  ;;  %196 = vperm.xlu0 %614, %v55_v5  }
  0x27   :  { %192 = vperm.xlu1 %615, %v54_v7  }
  0x2a   :  { %184 = vperm.xlu0 %614, %v52_v9  }
  0x2b   :  { %188 = vperm.xlu1 %615, %v53_v6  }
  0x2e   :  { %617 = vset.pattern.permute.xlu0 %v691_v32 }
  0x2f   :  { %616 = vset.pattern.permute.xlu1 %v691_v32  ;;  %310 = vperm.xlu0 %617, %v54_v7   ;;  %v51_v7 = vld [vmem:[#allocation5 + $0x60] sm:$0xf] }
  0x30   :  { %314 = vperm.xlu1 %616, %v55_v5  }
  0x33   :  { %618 = vset.pattern.permute.xlu0 %v694_v54 }
  0x34   :  { %306 = vperm.xlu1 %616, %v53_v6   ;;  %420 = vperm.xlu0 %618, %v56_v53  }
  0x38   :  { %302 = vperm.xlu1 %616, %v52_v9  }
  0x98   :  { %v75_v12 = vpop.permute.xlu0 %74 }
  0x99   :  { %v65_v13 = vpop.permute.xlu1 %64 }
  0x9c   :  { %v70_v17 = vpop.permute.xlu0 %69 }
  0x9d   :  { %v60_v19 = vpop.permute.xlu1 %59 }
  0xa1   :  { %v197_v34 = vpop.permute.xlu0 %196 }
  0xa2   :  { %v193_v33 = vpop.permute.xlu1 %192 }
  0xa5   :  { %v185_v40 = vpop.permute.xlu0 %184 }
  0xa6   :  { %v189_v37 = vpop.permute.xlu1 %188 }
  0xaa   :  { %v311_v60 = vpop.permute.xlu0 %310 }
  0xab   :  { %v315_v55 = vpop.permute.xlu1 %314 }
  0xaf   :  { %v307_v56 = vpop.permute.xlu1 %306  ;;  %v421_v8 = vpop.permute.xlu0 %420 }
  0xb3   :  { %v303_v62 = vpop.permute.xlu1 %302 }
  0xde   :  { %v558_v14 = vpop.f32.mrf.mxu0 }
  0xdf   :  { %v166_v21 = vadd.f32 %v558_v14, %v65_v13 }
  0xe0   :  { %v160_v15 = vpop.f32.mrf.mxu0 }
  0xe1   :  { %v161_v24 = vadd.f32 %v160_v15, %v60_v19  ;;  %v180_v26 = vmax.f32 %v166_v21, 0.0 }
  0xe2   :  { %v561_v16 = vpop.f32.mrf.mxu0 }
  0xe3   :  { %v176_v18 = vadd.f32 %v561_v16, %v75_v12  ;;  %v179_v27 = vmax.f32 %v161_v24, 0.0 }
  0xe4   :  { %v170_v20 = vpop.f32.mrf.mxu0 }
  0xe5   :  { %v182_v22 = vmax.f32 %v176_v18, 0.0  ;;  %v171_v23 = vadd.f32 %v170_v20, %v70_v17 }
  0xe7   :  { %v181_v25 = vmax.f32 %v171_v23, 0.0  ;;  %562 = vmatprep.subr.mxu1 %v182_v22 }
  0xe8   :  { %563 = vmatpush3.msra.mxu1 %v182_v22 }
  0xe9   :  { %564 = vmatprep.subr.mxu1 %v181_v25 }
  0xea   :  { %565 = vmatpush3.msra.mxu1 %v181_v25 }
  0xeb   :  { %566 = vmatprep.subr.mxu1 %v180_v26 }
  0xec   :  { %567 = vmatpush3.msra.mxu1 %v180_v26 }
  0xed   :  { %568 = vmatprep.subr.mxu1 %v179_v27 }
  0xee   :  { %569 = vmatpush3.msra.mxu1 %v179_v27 }
  0xef   :  { %571 = vmatmul.mubr.msk.f32.vlgmr.msra.gmra.mxu1 %vm199_vm2, %v44_v28  ;;  %590 = vmatprep.subr.mxu1 %v692_v52 }
  0xf0   :  { %573 = vmatprep.mubr.msk.f32.mxu1 %vm199_vm2, %v45_v29 }
  0xf3   :  { %574 = vmatmul.mubr.msk.f32.gmra.mxu1 %vm199_vm2, %v46_v30 }
  0xf4   :  { %598 = vmatprep.mubr.msk.f32.mxu1 %vm693_vm3, %v692_v52 }
 0x1af   :  { %v572_v35 = vpop.f32.mrf.mxu1 }
 0x1b0   :  { %v284_v42 = vadd.f32 %v572_v35, %v189_v37 }
 0x1b1   :  { %v278_v36 = vpop.f32.mrf.mxu1 }
 0x1b2   :  { %v279_v45 = vadd.f32 %v278_v36, %v185_v40  ;;  %v298_v47 = vmax.f32 %v284_v42, 0.0 }
 0x1b3   :  { %v575_v38 = vpop.f32.mrf.mxu1 }
 0x1b4   :  { %v294_v39 = vadd.f32 %v575_v38, %v197_v34  ;;  %v297_v48 = vmax.f32 %v279_v45, 0.0 }
 0x1b5   :  { %v288_v41 = vpop.f32.mrf.mxu1 }
 0x1b6   :  { %v300_v43 = vmax.f32 %v294_v39, 0.0  ;;  %v289_v44 = vadd.f32 %v288_v41, %v193_v33 }
 0x1b8   :  { %v299_v46 = vmax.f32 %v289_v44, 0.0  ;;  %576 = vmatprep.subr.mxu0 %v300_v43 }
 0x1b9   :  { %577 = vmatpush3.msra.mxu0 %v300_v43 }
 0x1ba   :  { %578 = vmatprep.subr.mxu0 %v299_v46 }
 0x1bb   :  { %579 = vmatpush3.msra.mxu0 %v299_v46 }
 0x1bc   :  { %580 = vmatprep.subr.mxu0 %v298_v47 }
 0x1bd   :  { %581 = vmatpush3.msra.mxu0 %v298_v47 }
 0x1be   :  { %582 = vmatprep.subr.mxu0 %v297_v48 }
 0x1bf   :  { %583 = vmatpush3.msra.mxu0 %v297_v48 }
 0x1c0   :  { %585 = vmatmul.mubr.msk.f32.vlgmr.msra.gmra.mxu0 %vm199_vm2, %v48_v49 }
 0x1c1   :  { %587 = vmatprep.mubr.msk.f32.mxu0 %vm199_vm2, %v49_v50 }
 0x1c4   :  { %588 = vmatmul.mubr.msk.f32.gmra.mxu0 %vm199_vm2, %v50_v51 }
 0x280   :  { %v586_v57 = vpop.f32.mrf.mxu0 }
 0x281   :  { %v401_v0 = vadd.f32 %v586_v57, %v307_v56 }
 0x282   :  { %v395_v58 = vpop.f32.mrf.mxu0 }
 0x283   :  { %v396_v3 = vadd.f32 %v395_v58, %v303_v62  ;;  %v415_v5 = vmax.f32 %v401_v0, 0.0 }
 0x284   :  { %v589_v59 = vpop.f32.mrf.mxu0 }
 0x285   :  { %v411_v61 = vadd.f32 %v589_v59, %v315_v55  ;;  %v414_v6 = vmax.f32 %v396_v3, 0.0 }
 0x286   :  { %v405_v63 = vpop.f32.mrf.mxu0 }
 0x287   :  { %v417_v1 = vmax.f32 %v411_v61, 0.0  ;;  %v406_v2 = vadd.f32 %v405_v63, %v311_v60 }
 0x289   :  { %v416_v4 = vmax.f32 %v406_v2, 0.0  ;;  %591 = vmatpush3.msra.mxu1 %v417_v1 }
 0x28a   :  { %592 = vmatprep.subr.mxu1 %v692_v52 }
 0x28b   :  { %593 = vmatpush3.msra.mxu1 %v416_v4 }
 0x28c   :  { %594 = vmatprep.subr.mxu1 %v692_v52 }
 0x28d   :  { %595 = vmatpush3.msra.mxu1 %v415_v5 }
 0x28e   :  { %596 = vmatprep.subr.mxu1 %v692_v52 }
 0x28f   :  { %597 = vmatpush3.msra.mxu1 %v414_v6 }
 0x290   :  { %599 = vmatmul.mubr.msk.f32.vlgmr.msra.gmra.mxu1 %vm199_vm2, %v51_v7 }
 0x350   :  { %v492_v9 = vpop.f32.mrf.mxu1 }
 0x351   :  { %v493_v10 = vadd.f32 %v492_v9, %v421_v8 }
 0x352   :  { %v600_v11 = vpop.f32.mrf.mxu1 }
 0x353   :  { %497 = vst.msk [vmem:[#allocation7] sm:$0xf] %vm496_vm4, %v493_v10 }
 0x354   :  { %670 = shalt.err (!%p667_p0)
}
 0x355   :  { %507 = dma.vmem_to_hbm [thread:$0]  %s505_s1, 64, %s735_s2, [#allocation4]  }
 0x356   :  { %683 = dma.done.wait [#allocation4], 64  }
 0x357   :  { %684 = vsyncadd [#allocation4], 4294967232 }
 0x358   :  { %511 = vsyncpa [#allocation3], 1 }
 0x359   :  { %512 = vsyncpa [#allocation6], 1 }
 0x35a   :  { %513 = vsyncpa [#allocation4], 1 }

</bundles_post_ra>
